<compile_context>
chip_gen: v7x
topology: tpu7x:2x2x1
jax: 0.10.0
libtpu: 0.0.40
codegen_flags: <defaults>
</compile_context>

<pallas_src>
import functools

import jax
import jax.numpy as jnp
from jax.experimental import pallas as pl
from jax.experimental.pallas import tpu as pltpu

DROPOUT_RATE = 0.15
_KEEP_RATE = 1.0 - DROPOUT_RATE
# keep element iff (hash & 0xFFFFFF) >= DROPOUT_RATE * 2^24  (low 24 bits only,
# so the signed int32 compare is exact and portable).
_DROP_THRESHOLD_24 = int(round(DROPOUT_RATE * (1 << 24)))

IN_F, H1_F, H2_F = 69, 69, 24


def _round_up(n: int, m: int) -> int:
    return ((n + m - 1) // m) * m


def qnet_kernel(seed_ref,                 # scalar prefetch (SMEM): (1,) int32
                x_ref,                    # (TB, 69)  f32 or bf16
                w1_ref, b1_ref,           # (69, 69) bf16 , (1, 69) f32
                w2_ref, b2_ref,           # (69, 24) bf16 , (1, 24) f32
                w3_ref, b3_ref,           # (1, 24)  f32  , (1, 24) f32 (= b3/24)
                o_ref,                    # (1, TB)  f32  (lane-dense row)
                *, apply_dropout: bool):
    # ---- fc1 on the MXU (bf16 x bf16 -> f32 accumulate), bias/ReLU in f32 ----
    xb = x_ref[...].astype(jnp.bfloat16)
    h1 = jnp.dot(xb, w1_ref[...], preferred_element_type=jnp.float32) + b1_ref[...]
    h1 = jnp.maximum(h1, 0.0)

    # ---- Dropout(p=0.15), training semantics.  The 1/(1-p) rescale is folded
    # into (w1, b1) by the wrapper, so only the keep-mask select runs here. ----
    if apply_dropout:
        tb, nf = h1.shape
        # Tile index mixed into a scalar salt (scalar unit) -> short vector hash.
        salt = (seed_ref[0].astype(jnp.uint32) * jnp.uint32(0x9E3779B1)) ^ (
            (pl.program_id(0).astype(jnp.uint32) + jnp.uint32(0x85EBCA6B))
            * jnp.uint32(0xC2B2AE35))
        row = jax.lax.broadcasted_iota(jnp.int32, (tb, nf), 0).astype(jnp.uint32)
        col = jax.lax.broadcasted_iota(jnp.int32, (tb, nf), 1).astype(jnp.uint32)
        h = row * jnp.uint32(0x9E3779B1) + col * jnp.uint32(0x85EBCA77) + salt
        h ^= h >> 16
        h *= jnp.uint32(0x7FEB352D)
        h ^= h >> 15
        r24 = (h & jnp.uint32(0x00FFFFFF)).astype(jnp.int32)
        keep = r24 >= jnp.int32(_DROP_THRESHOLD_24)
        h1 = jnp.where(keep, h1, 0.0)

    # ---- fc2 on the MXU + bias + ReLU ----
    h2 = jnp.dot(h1.astype(jnp.bfloat16), w2_ref[...],
                 preferred_element_type=jnp.float32) + b2_ref[...]
    h2 = jnp.maximum(h2, 0.0)

    # ---- fc3 as VPU multiply + lane reduce (K=24, N=1 would waste a full MXU
    # tile).  b3 arrives pre-divided by 24 and broadcast over the 24 lanes, so
    # the reduce already includes the bias:  sum_k (h2_k*w3_k + b3/24) = h2@w3+b3.
    logits = jnp.sum(h2 * w3_ref[...] + b3_ref[...], axis=-1)      # (TB,)
    o_ref[0, :] = jax.nn.sigmoid(logits)                           # lane-dense row


def qnet_forward(x, params, seed, *, training=True, block_rows=2048):
    """x: (B, 69) float32 or bfloat16; params from init_params; seed: python int."""
    B, F = x.shape
    assert F == IN_F, F

    # ---------- parameter prep (wrapper time, tiny arrays) ----------
    inv_keep = jnp.float32(1.0 / _KEEP_RATE) if training else jnp.float32(1.0)
    # Fold the dropout rescale into fc1 (positive scale commutes with ReLU and
    # with the mask) so the kernel only applies the 0/1 mask.
    w1 = (params["w1"].astype(jnp.float32) * inv_keep).astype(jnp.bfloat16)
    b1 = (params["b1"].astype(jnp.float32) * inv_keep)
    w2 = params["w2"].astype(jnp.bfloat16)
    b2 = params["b2"].astype(jnp.float32)
    # fc3 runs on the VPU: w3 as a (1, 24) f32 row; b3 pre-divided by 24 and
    # broadcast to (1, 24) so it can ride along inside the lane reduce.
    w3 = params["w3"].reshape(1, H2_F).astype(jnp.float32)
    b3 = (params["b3"].reshape(1, 1).astype(jnp.float32) / H2_F) * jnp.ones(
        (1, H2_F), jnp.float32)

    # ---------- batch tiling ----------
    # Granule of 16 keeps bf16 sublane packing happy; cap TB so moderate B gets
    # >= 2 grid steps (lets "parallel" shard tiles across v7x's 2 TensorCores).
    if B <= 16:
        TB = B                                    # full-extent block: always legal
    else:
        TB = min(block_rows, _round_up((B + 1) // 2, 16))
    num_tiles = pl.cdiv(B, TB)
    grid = (num_tiles,)

    seed_arr = jnp.asarray([seed], dtype=jnp.int32)

    def const_spec(shape):
        # Weights / biases: same block every grid step -> stay VMEM-resident.
        return pl.BlockSpec(shape, lambda i, seed_ref: (0,) * len(shape))

    kernel = functools.partial(qnet_kernel, apply_dropout=training)

    flops = 2 * B * (IN_F * H1_F + H1_F * H2_F + H2_F)
    bytes_accessed = int(x.nbytes + B * 4 + w1.nbytes + b1.nbytes +
                         w2.nbytes + b2.nbytes + w3.nbytes + b3.nbytes)

    out = pl.pallas_call(
        kernel,
        # Lane-dense output: one (1, TB) row per batch tile; reshaped to (B, 1)
        # below.  Rows past B in the last tile are padding and get sliced off
        # (they do flow through sigmoid, which is benign on TPU).
        out_shape=jax.ShapeDtypeStruct((num_tiles, TB), jnp.float32),
        grid_spec=pltpu.PrefetchScalarGridSpec(
            num_scalar_prefetch=1,
            grid=grid,
            in_specs=[
                pl.BlockSpec((TB, IN_F), lambda i, seed_ref: (i, 0)),   # x tiles
                const_spec(w1.shape), const_spec(b1.shape),
                const_spec(w2.shape), const_spec(b2.shape),
                const_spec(w3.shape), const_spec(b3.shape),
            ],
            out_specs=pl.BlockSpec((1, TB), lambda i, seed_ref: (i, 0)),
        ),
        compiler_params=pltpu.CompilerParams(
            dimension_semantics=("parallel",),        # shard tiles across TCs (v7x)
            vmem_limit_bytes=32 * 1024 * 1024,        # room for 2048-row tiles
        ),
        cost_estimate=pl.CostEstimate(
            flops=flops, transcendentals=B, bytes_accessed=bytes_accessed),
    )(seed_arr, x, w1, b1, w2, b2, w3, b3)

    return out.reshape(-1)[:B].reshape(B, 1)


def qnet_reference(x, params):
    """Pure-JAX f32 reference (eval mode: dropout is identity)."""
    h1 = jnp.maximum(x @ params["w1"] + params["b1"], 0.0)
    h2 = jnp.maximum(h1 @ params["w2"] + params["b2"], 0.0)
    return jax.nn.sigmoid(h2 @ params["w3"] + params["b3"])


def init_params(key):
    """Deterministic init mimicking PyTorch Linear default (uniform +/-1/sqrt(fan_in)).
    Weights stored as (in_features, out_features)."""
    dims = [(IN_F, H1_F), (H1_F, H2_F), (H2_F, 1)]
    params = {}
    for idx, (fan_in, fan_out) in enumerate(dims, start=1):
        key, kw, kb = jax.random.split(key, 3)
        bound = 1.0 / jnp.sqrt(jnp.float32(fan_in))
        params[f"w{idx}"] = jax.random.uniform(
            kw, (fan_in, fan_out), jnp.float32, -bound, bound)
        params[f"b{idx}"] = jax.random.uniform(
            kb, (1, fan_out), jnp.float32, -bound, bound)
    return params


if __name__ == "__main__":
    key = jax.random.PRNGKey(0)
    key, kx = jax.random.split(key)
    params = init_params(key)

    # --- small single-tile test (B=8), x passed as bf16 (the intended fast path)
    B = 8
    x = jax.random.normal(kx, (B, IN_F), dtype=jnp.float32)
    x_bf16 = x.astype(jnp.bfloat16)

    out_train = jax.block_until_ready(
        qnet_forward(x_bf16, params, seed=0, training=True))
    assert out_train.shape == (B, 1), out_train.shape
    assert bool(jnp.all((out_train >= 0.0) & (out_train <= 1.0))), "sigmoid out of range"

    out_eval = jax.block_until_ready(
        qnet_forward(x_bf16, params, seed=0, training=False))
    ref = qnet_reference(x, params)
    # bf16 matmul inputs vs f32 reference -> loosened tolerance (see review notes).
    assert bool(jnp.allclose(out_eval, ref, atol=2e-2, rtol=0.0)), "mismatch vs reference"

    # --- multi-tile test (grid=2 with a padded final tile), f32 input path
    B2 = 40
    key, kx2 = jax.random.split(key)
    x2 = jax.random.normal(kx2, (B2, IN_F), dtype=jnp.float32)
    out2_train = jax.block_until_ready(qnet_forward(x2, params, seed=3, training=True))
    assert out2_train.shape == (B2, 1), out2_train.shape
    assert bool(jnp.all((out2_train >= 0.0) & (out2_train <= 1.0))), "tiled out of range"
    out2_eval = jax.block_until_ready(qnet_forward(x2, params, seed=3, training=False))
    ref2 = qnet_reference(x2, params)
    assert bool(jnp.allclose(out2_eval, ref2, atol=2e-2, rtol=0.0)), "tiled mismatch"

    print("KERNEL_OK")
</pallas_src>

<mosaic_0001>
module attributes {stable_mosaic.version = 11 : i64} {
  func.func @qnet_kernel(%arg0: i32, %arg1: memref<1xi32, #tpu.memory_space<smem>>, %arg2: memref<8x69xbf16, #tpu.memory_space<vmem>>, %arg3: memref<69x69xbf16, #tpu.memory_space<vmem>>, %arg4: memref<1x69xf32, #tpu.memory_space<vmem>>, %arg5: memref<69x24xbf16, #tpu.memory_space<vmem>>, %arg6: memref<1x24xf32, #tpu.memory_space<vmem>>, %arg7: memref<1x24xf32, #tpu.memory_space<vmem>>, %arg8: memref<1x24xf32, #tpu.memory_space<vmem>>, %arg9: memref<1x8xf32, #tpu.memory_space<vmem>>) attributes {dimension_semantics = [#tpu.dimension_semantics<parallel>], iteration_bounds = array<i64: 1>, scalar_prefetch = 1 : i64, scratch_operands = 0 : i64, tpu.core_type = #tpu.core_type<tc>, window_params = [{transform_indices = @transform_0, window_bounds = array<i64: 8, 69>}, {pipeline_mode = #tpu.pipeline_mode<synchronous>, transform_indices = @transform_1, window_bounds = array<i64: 69, 69>}, {pipeline_mode = #tpu.pipeline_mode<synchronous>, transform_indices = @transform_2, window_bounds = array<i64: 1, 69>}, {pipeline_mode = #tpu.pipeline_mode<synchronous>, transform_indices = @transform_3, window_bounds = array<i64: 69, 24>}, {pipeline_mode = #tpu.pipeline_mode<synchronous>, transform_indices = @transform_4, window_bounds = array<i64: 1, 24>}, {pipeline_mode = #tpu.pipeline_mode<synchronous>, transform_indices = @transform_5, window_bounds = array<i64: 1, 24>}, {pipeline_mode = #tpu.pipeline_mode<synchronous>, transform_indices = @transform_6, window_bounds = array<i64: 1, 24>}, {transform_indices = @transform_7, window_bounds = array<i64: 1, 8>}]} {
    %c0 = arith.constant 0 : index
    %c0_0 = arith.constant 0 : index
    %0 = vector.load %arg2[%c0, %c0_0] : memref<8x69xbf16, #tpu.memory_space<vmem>>, vector<8x69xbf16>
    %c0_1 = arith.constant 0 : index
    %c0_2 = arith.constant 0 : index
    %1 = vector.load %arg3[%c0_1, %c0_2] : memref<69x69xbf16, #tpu.memory_space<vmem>>, vector<69x69xbf16>
    %cst = arith.constant dense<0.000000e+00> : vector<8x69xf32>
    %2 = tpu.matmul %0, %1, %cst {dimension_numbers = #tpu.dot_dimension_numbers<[1], [0], [0], [1], [0, 0, 1, 1], [], []>} : vector<8x69xbf16>, vector<69x69xbf16>, vector<8x69xf32> -> vector<8x69xf32>
    %c0_3 = arith.constant 0 : index
    %c0_4 = arith.constant 0 : index
    %3 = vector.load %arg4[%c0_3, %c0_4] : memref<1x69xf32, #tpu.memory_space<vmem>>, vector<1x69xf32>
    %4 = vector.broadcast %3 : vector<1x69xf32> to vector<8x69xf32>
    %5 = arith.addf %2, %4 : vector<8x69xf32>
    %cst_5 = arith.constant 0.000000e+00 : f32
    %6 = vector.broadcast %cst_5 : f32 to vector<8x69xf32>
    %7 = arith.maximumf %5, %6 : vector<8x69xf32>
    %c0_6 = arith.constant 0 : index
    %8 = memref.load %arg1[%c0_6] : memref<1xi32, #tpu.memory_space<smem>>
    %c-1640531535_i32 = arith.constant -1640531535 : i32
    %9 = arith.muli %8, %c-1640531535_i32 : i32
    %c-2048144789_i32 = arith.constant -2048144789 : i32
    %10 = arith.addi %arg0, %c-2048144789_i32 : i32
    %c-1028477387_i32 = arith.constant -1028477387 : i32
    %11 = arith.muli %10, %c-1028477387_i32 : i32
    %12 = arith.xori %9, %11 : i32
    %13 = tpu.iota {dimensions = array<i32: 0>} : vector<8x69xi32>
    %14 = tpu.iota {dimensions = array<i32: 1>} : vector<8x69xi32>
    %c-1640531535_i32_7 = arith.constant -1640531535 : i32
    %15 = vector.broadcast %c-1640531535_i32_7 : i32 to vector<8x69xi32>
    %16 = arith.muli %13, %15 : vector<8x69xi32>
    %c-2048144777_i32 = arith.constant -2048144777 : i32
    %17 = vector.broadcast %c-2048144777_i32 : i32 to vector<8x69xi32>
    %18 = arith.muli %14, %17 : vector<8x69xi32>
    %19 = arith.addi %16, %18 : vector<8x69xi32>
    %20 = vector.broadcast %12 : i32 to vector<8x69xi32>
    %21 = arith.addi %19, %20 : vector<8x69xi32>
    %c16_i32 = arith.constant 16 : i32
    %22 = vector.broadcast %c16_i32 : i32 to vector<8x69xi32>
    %23 = arith.shrui %21, %22 : vector<8x69xi32>
    %24 = arith.xori %21, %23 : vector<8x69xi32>
    %c2146121005_i32 = arith.constant 2146121005 : i32
    %25 = vector.broadcast %c2146121005_i32 : i32 to vector<8x69xi32>
    %26 = arith.muli %24, %25 : vector<8x69xi32>
    %c15_i32 = arith.constant 15 : i32
    %27 = vector.broadcast %c15_i32 : i32 to vector<8x69xi32>
    %28 = arith.shrui %26, %27 : vector<8x69xi32>
    %29 = arith.xori %26, %28 : vector<8x69xi32>
    %c16777215_i32 = arith.constant 16777215 : i32
    %30 = vector.broadcast %c16777215_i32 : i32 to vector<8x69xi32>
    %31 = arith.andi %29, %30 : vector<8x69xi32>
    %c2516582_i32 = arith.constant 2516582 : i32
    %32 = vector.broadcast %c2516582_i32 : i32 to vector<8x69xi32>
    %33 = arith.cmpi sge, %31, %32 : vector<8x69xi32>
    %cst_8 = arith.constant 0.000000e+00 : f32
    %34 = vector.broadcast %cst_8 : f32 to vector<8x69xf32>
    %35 = arith.select %33, %7, %34 : vector<8x69xi1>, vector<8x69xf32>
    %36 = arith.truncf %35 : vector<8x69xf32> to vector<8x69xbf16>
    %c0_9 = arith.constant 0 : index
    %c0_10 = arith.constant 0 : index
    %37 = vector.load %arg5[%c0_9, %c0_10] : memref<69x24xbf16, #tpu.memory_space<vmem>>, vector<69x24xbf16>
    %cst_11 = arith.constant dense<0.000000e+00> : vector<8x24xf32>
    %38 = tpu.matmul %36, %37, %cst_11 {dimension_numbers = #tpu.dot_dimension_numbers<[1], [0], [0], [1], [0, 0, 1, 1], [], []>} : vector<8x69xbf16>, vector<69x24xbf16>, vector<8x24xf32> -> vector<8x24xf32>
    %c0_12 = arith.constant 0 : index
    %c0_13 = arith.constant 0 : index
    %39 = vector.load %arg6[%c0_12, %c0_13] : memref<1x24xf32, #tpu.memory_space<vmem>>, vector<1x24xf32>
    %40 = vector.broadcast %39 : vector<1x24xf32> to vector<8x24xf32>
    %41 = arith.addf %38, %40 : vector<8x24xf32>
    %cst_14 = arith.constant 0.000000e+00 : f32
    %42 = vector.broadcast %cst_14 : f32 to vector<8x24xf32>
    %43 = arith.maximumf %41, %42 : vector<8x24xf32>
    %c0_15 = arith.constant 0 : index
    %c0_16 = arith.constant 0 : index
    %44 = vector.load %arg7[%c0_15, %c0_16] : memref<1x24xf32, #tpu.memory_space<vmem>>, vector<1x24xf32>
    %45 = vector.broadcast %44 : vector<1x24xf32> to vector<8x24xf32>
    %46 = arith.mulf %43, %45 : vector<8x24xf32>
    %c0_17 = arith.constant 0 : index
    %c0_18 = arith.constant 0 : index
    %47 = vector.load %arg8[%c0_17, %c0_18] : memref<1x24xf32, #tpu.memory_space<vmem>>, vector<1x24xf32>
    %48 = vector.broadcast %47 : vector<1x24xf32> to vector<8x24xf32>
    %49 = arith.addf %46, %48 : vector<8x24xf32>
    %cst_19 = arith.constant dense<0.000000e+00> : vector<8xf32>
    %50 = vector.multi_reduction <add>, %49, %cst_19 [1] : vector<8x24xf32> to vector<8xf32>
    %51 = arith.negf %50 : vector<8xf32>
    %52 = math.exp %51 : vector<8xf32>
    %cst_20 = arith.constant 1.000000e+00 : f32
    %53 = vector.broadcast %cst_20 : f32 to vector<8xf32>
    %54 = arith.addf %53, %52 : vector<8xf32>
    %55 = arith.divf %53, %54 : vector<8xf32>
    %c0_21 = arith.constant 0 : index
    %c0_22 = arith.constant 0 : index
    %56 = vector.load %arg9[%c0_21, %c0_22] : memref<1x8xf32, #tpu.memory_space<vmem>>, vector<1x8xf32>
    %57 = vector.shape_cast %56 : vector<1x8xf32> to vector<8xf32>
    %58 = vector.shape_cast %55 : vector<8xf32> to vector<1x8xf32>
    tpu.vector_store %arg9[%c0_21, %c0_22], %58 {strides = array<i32>} : memref<1x8xf32, #tpu.memory_space<vmem>>, vector<1x8xf32>,
    return
  }
  func.func @transform_0(%arg0: i32, %arg1: memref<1xi32, #tpu.memory_space<smem>>) -> (i32, i32) {
    %c0_i32 = arith.constant 0 : i32
    %c0_i32_0 = arith.constant 0 : i32
    return %arg0, %c0_i32 : i32, i32
  }
  func.func @transform_1(%arg0: i32, %arg1: memref<1xi32, #tpu.memory_space<smem>>) -> (i32, i32) {
    %c0_i32 = arith.constant 0 : i32
    %c0_i32_0 = arith.constant 0 : i32
    %c0_i32_1 = arith.constant 0 : i32
    return %c0_i32, %c0_i32_0 : i32, i32
  }
  func.func @transform_2(%arg0: i32, %arg1: memref<1xi32, #tpu.memory_space<smem>>) -> (i32, i32) {
    %c0_i32 = arith.constant 0 : i32
    %c0_i32_0 = arith.constant 0 : i32
    %c0_i32_1 = arith.constant 0 : i32
    return %c0_i32, %c0_i32_0 : i32, i32
  }
  func.func @transform_3(%arg0: i32, %arg1: memref<1xi32, #tpu.memory_space<smem>>) -> (i32, i32) {
    %c0_i32 = arith.constant 0 : i32
    %c0_i32_0 = arith.constant 0 : i32
    %c0_i32_1 = arith.constant 0 : i32
    return %c0_i32, %c0_i32_0 : i32, i32
  }
  func.func @transform_4(%arg0: i32, %arg1: memref<1xi32, #tpu.memory_space<smem>>) -> (i32, i32) {
    %c0_i32 = arith.constant 0 : i32
    %c0_i32_0 = arith.constant 0 : i32
    %c0_i32_1 = arith.constant 0 : i32
    return %c0_i32, %c0_i32_0 : i32, i32
  }
  func.func @transform_5(%arg0: i32, %arg1: memref<1xi32, #tpu.memory_space<smem>>) -> (i32, i32) {
    %c0_i32 = arith.constant 0 : i32
    %c0_i32_0 = arith.constant 0 : i32
    %c0_i32_1 = arith.constant 0 : i32
    return %c0_i32, %c0_i32_0 : i32, i32
  }
  func.func @transform_6(%arg0: i32, %arg1: memref<1xi32, #tpu.memory_space<smem>>) -> (i32, i32) {
    %c0_i32 = arith.constant 0 : i32
    %c0_i32_0 = arith.constant 0 : i32
    %c0_i32_1 = arith.constant 0 : i32
    return %c0_i32, %c0_i32_0 : i32, i32
  }
  func.func @transform_7(%arg0: i32, %arg1: memref<1xi32, #tpu.memory_space<smem>>) -> (i32, i32) {
    %c0_i32 = arith.constant 0 : i32
    %c0_i32_0 = arith.constant 0 : i32
    return %arg0, %c0_i32 : i32, i32
  }
}

</mosaic_0001>

<bundles_post_ra>
// kernel: tpu_custom_call.1
= control target key start
LH: loop header
LB: loop body
LE: loop exit
PB: predicated region body
PF: predicated region fallthrough
CT: control target
= control target key end

     0   :  { %v386_v1 = vmov 0.0   ;;  %vm78_vm0 = vcmask 1041408   ;;  %vm387_vm1 = vmmov 0   ;;  %vm79_vm2 = vcmask 1042432   ;;  %s497_s0 = inlined_call_operand.<no memory space> [shape: s32[1], index: 0, kind: input, shape index: {}]   ;;  %s498_s1 = inlined_call_operand.vmem [shape: bf16[8,69], index: 1, kind: input, shape index: {}]   ;;  %s499_s2 = inlined_call_operand.vmem [shape: bf16[69,69], index: 2, kind: input, shape index: {}]   ;;  %s500_s3 = inlined_call_operand.vmem [shape: f32[1,69], index: 3, kind: input, shape index: {}]   ;;  %s501_s4 = inlined_call_operand.vmem [shape: bf16[69,24], index: 4, kind: input, shape index: {}]   ;;  %s502_s5 = inlined_call_operand.vmem [shape: f32[1,24], index: 5, kind: input, shape index: {}]   ;;  %s503_s6 = inlined_call_operand.vmem [shape: f32[1,24], index: 6, kind: input, shape index: {}]   ;;  %s504_s7 = inlined_call_operand.vmem [shape: f32[1,24], index: 7, kind: input, shape index: {}]   ;;  %s505_s8 = inlined_call_operand.hbm [shape: f32[1,8], index: 8, kind: output, shape index: {}]  }
   0x1   :  { %v348_v0 = vld [vmem:[%s499_s2] sm:$0xff]   ;;  %316 = vmatprep.subr.bf16.mxu0 %v386_v1  ;;  %330 = vmatprep.subr.bf16.mxu1 %v386_v1  ;;  %v349_v2 = vld [vmem:[%s499_s2 + $0x8] sm:$0xff]   ;;  %v350_v3 = vld [vmem:[%s499_s2 + $0x10] sm:$0xff]   ;;  %v388_v6 = vmov 65535  }
   0x2   :  { %317 = vmatpush3.bf16.msra.mxu0 %v348_v0  ;;  %v353_v4 = vld [vmem:[%s501_s4] sm:$0xff]   ;;  %326 = vmatprep.mubr.msk.bf16.mxu0 %vm387_vm1, %v386_v1  ;;  %v354_v5 = vld [vmem:[%s501_s4 + $0x8] sm:$0xff]   ;;  %v80_v7 = vsel %vm78_vm0, 4294967295, %v388_v6  ;;  %v351_v8 = vld [vmem:[%s499_s2 + $0x18] sm:$0xff]  }
   0x3   :  { %318 = vmatprep.subr.bf16.mxu0 %v386_v1  ;;  %331 = vmatpush3.bf16.msra.mxu1 %v353_v4  ;;  %v352_v9 = vld [vmem:[%s499_s2 + $0x20] ss:$0 sps:$4 sm:$0x77]  }
   0x4   :  { %332 = vmatprep.subr.bf16.mxu1 %v386_v1  ;;  %340 = vmatprep.mubr.msk.bf16.mxu1 %vm387_vm1, %v386_v1 }
   0x6   :  { %319 = vmatpush3.bf16.msra.mxu0 %v349_v2 }
   0x7   :  { %320 = vmatprep.subr.bf16.mxu0 %v386_v1 }
   0xa   :  { %321 = vmatpush3.bf16.msra.mxu0 %v350_v3 }
   0xb   :  { %14 = vsyncpa [#allocation5], 0  ;;  %322 = vmatprep.subr.bf16.mxu0 %v386_v1  ;;  %v81_v10 = vsel %vm79_vm2, %v80_v7, 0  ;;  %333 = vmatpush3.bf16.msra.mxu1 %v354_v5  ;;  %v355_v11 = vld [vmem:[%s501_s4 + $0x10] sm:$0xff]   ;;  %v30_v13 = vld [vmem:[%s498_s1] sm:$0xf]  ;;  %v131_v17 = vlaneseq }
   0xc   :  { %334 = vmatprep.subr.bf16.mxu1 %v386_v1  ;;  %v83_v12 = vand.u32 %v352_v9, %v81_v10  ;;  %vm74_vm3 = vcmask 564224   ;;  %v356_v14 = vld [vmem:[%s501_s4 + $0x18] sm:$0xff]   ;;  %v357_v15 = vld [vmem:[%s501_s4 + $0x20] ss:$0 sps:$4 sm:$0x77]   ;;  %vm255_vm5 = vcmask 195584  }
   0xd   :  { %v196_v16 = vand.u32 %v357_v15, %v81_v10  ;;  %v132_v18 = vshrl.u32 %v131_v17, 7  ;;  %v134_v19 = vand.u32 127, %v131_v17  ;;  %s127_s27 = smul.u32 2654435761, %s497_s0  ;;  %v287_v30 = vld [vmem:[%s500_s3] ss:$0 sm:$0xff] }
   0xe   :  { %323 = vmatpush3.bf16.msra.mxu0 %v351_v8  ;;  %v294_v40 = vld [vmem:[%s502_s5] ss:$0 sm:$0xff]  ;;  %s389_s5 = smov [#allocation4]   ;;  %vm271_vm6 = vcmask 57344  }
   0xf   :  { %324 = vmatprep.subr.bf16.mxu0 %v386_v1  ;;  %335 = vmatpush3.bf16.msra.mxu1 %v355_v11  ;;  %v135_v20 = vmul.u32 2654435761, %v132_v18  ;;  %v136_v21 = vmul.u32 2246822519, %v134_v19  ;;  %s130_s28 = sxor.u32 3519783463, %s127_s27  ;;  %v268_v56 = vsub.s32 %v134_v19, %v132_v18 }
  0x10   :  { %336 = vmatprep.subr.bf16.mxu1 %v386_v1  ;;  %v138_v23 = vstv %s130_s28  ;;  %v301_v44 = vld [vmem:[%s503_s6] ss:$0 sm:$0xff]  ;;  %s279_s6 = sshll.u32 %s389_s5, 4  ;;  %s280_s6 = int_to_ptr.vmem [resolvable:$true] %s279_s6 }
  0x11   :  { %v137_v22 = vadd.s32 %v136_v21, %v135_v20  ;;  %v302_v48 = vld [vmem:[%s504_s7] ss:$0 sm:$0xff]  ;;  %s362_s7 = scalar_lea.vmem %s280_s6, 16  ;;  %s366_s12 = scalar_lea.vmem %s280_s6, 32 }
  0x12   :  { %325 = vmatpush3.bf16.msra.mxu0 %v83_v12  ;;  %p363_p0 = scmp.ne.s32.totalorder %s280_s6, %s362_s7  ;;  %p367_p1 = scmp.lt.s32.totalorder %s280_s6, %s280_s6 }
  0x13   :  { %337 = vmatpush3.bf16.msra.mxu1 %v356_v14  ;;  %v139_v24 = vadd.s32 %v138_v23, %v137_v22  ;;  %p368_p2 = scmp.lt.s32.totalorder %s366_s12, %s362_s7 }
  0x14   :  { %338 = vmatprep.subr.bf16.mxu1 %v386_v1 }
  0x15   :  { %327 = vmatmul.mubr.msk.bf16.vlgmr.msra.gmra.mrb[0].mxu0 %vm74_vm3, %v30_v13  ;;  %v140_v25 = vshrl.u32 %v139_v24, 16  ;;  %p369_p3 = por %p368_p2, %p367_p1 }
  0x17   :  { %339 = vmatpush3.bf16.msra.mxu1 %v196_v16  ;;  %v141_v26 = vxor.u32 %v140_v25, %v139_v24  ;;  %p370_p4 = pnand %p369_p3, %p363_p0 }
  0x19   :  { %v142_v27 = vmul.u32 2146121005, %v141_v26 }
  0x1b   :  { %v143_v28 = vshrl.u32 %v142_v27, 15 }
  0x1d   :  { %v144_v29 = vxor.u32 %v143_v28, %v142_v27 }
  0x1f   :  { %v145_v31 = vand.u32 16777215, %v144_v29 }
  0x21   :  { %vm146_vm4 = vcmp.ge.s32.totalorder %v145_v31, 2516582 }
  0xe8   :  { %v119_v32 = vpop.f32.mrb[0].mxu0 }
  0xe9   :  { %v120_v33 = vadd.f32 %v287_v30, %v119_v32  ;;  %v328_v34 = vpop.f32.mrb[1].mxu0 }
  0xea   :  { %v122_v35 = vpop.f32.mrb[2].mxu0 }
  0xeb   :  { %v125_v36 = vmax.f32 %v120_v33, 0.0  ;;  %v329_v37 = vpop.f32.mrb[3].mxu0 }
  0xed   :  { %v147_v38 = vsel %vm146_vm4, %v125_v36, 0.0 }
  0xee   :  { %v148_v39 = vpack.c.bf16 %v147_v38, %v147_v38 }
  0xf0   :  { %341 = vmatmul.mubr.msk.bf16.vlgmr.msra.gmra.mrb[0].mxu1 %vm74_vm3, %v148_v39 }
 0x1c3   :  { %v232_v41 = vpop.f32.mrb[0].mxu1 }
 0x1c4   :  { %v233_v42 = vadd.f32 %v294_v40, %v232_v41  ;;  %v342_v43 = vpop.f32.mrb[1].mxu1 }
 0x1c5   :  { %v235_v45 = vpop.f32.mrb[2].mxu1 }
 0x1c6   :  { %v238_v46 = vmax.f32 %v233_v42, 0.0  ;;  %v343_v47 = vpop.f32.mrb[3].mxu1 }
 0x1c8   :  { %v246_v49 = vmul.f32 %v301_v44, %v238_v46 }
 0x1ca   :  { %v254_v50 = vadd.f32 %v302_v48, %v246_v49 }
 0x1cc   :  { %v256_v51 = vsel %vm255_vm5, %v254_v50, 0.0 }
 0x1cd   :  { %257 = vadd.xlane.f32.xlu0 %v256_v51 }
 0x25a   :  { %v258_v52 = vpop.xlane.xlu0 %257 }
 0x25b   :  { %v303_v53 = vmul.f32 -1.442695, %v258_v52 }
 0x25d   :  { %358 = vpow2.f32 %v303_v53 }
 0x267   :  { %v359_v54 = vpop.eup %358 }
 0x268   :  { %v262_v55 = vadd.f32 1.0, %v359_v54 }
 0x26a   :  { %360 = vrcp.f32 %v262_v55 }
 0x274   :  { %v361_v57 = vpop.eup %360 }
 0x275   :  { %v269_v58 = vrot.slane %v361_v57, %v268_v56 }
 0x277   :  { %272 = vst.msk [vmem:[#allocation4] sm:$0x1] %vm271_vm6, %v269_v58 }
 0x278   :  { %373 = shalt.err (!%p370_p4)
}
 0x279   :  { %s374_s15 = scalar_lea.hbm %s505_s8, 16 }
 0x27a   :  { %p375_p5 = scmp.ne.s32.totalorder %s505_s8, %s374_s15  ;;  %p378_p6 = scmp.lt.u32.totalorder %s374_s15, %s505_s8 }
 0x27c   :  { %p380_p7 = pnand %p378_p6, %p375_p5 }
 0x27e   :  { %383 = shalt.err (!%p380_p7)
}
 0x27f   :  { %282 = dma.vmem_to_hbm [thread:$0]  %s280_s6, 16, %s505_s8, [#allocation5]  }
 0x280   :  { %384 = dma.done.wait [#allocation5], 16  }
 0x281   :  { %385 = vsyncadd [#allocation5], 4294967280 }
 0x282   :  { %286 = vsyncpa [#allocation5], 1 }

</bundles_post_ra>
